<compile_context>
chip_gen: v7x
topology: tpu7x:2x2x1
jax: 0.10.0
libtpu: 0.0.40
codegen_flags: <defaults>
</compile_context>

<pallas_src>
import numpy as np
import jax
import jax.numpy as jnp
from jax import lax
from jax.experimental import pallas as pl
from jax.experimental.pallas import tpu as pltpu


def _vmem_limit(block_bytes):
    # double-buffered blocks + margin, clamped to [32 MiB, 48 MiB] (v7x has 64 MiB / core).
    return int(min(48 << 20, max(32 << 20, 2 * block_bytes + (4 << 20))))


def _pick_spatial_tile(s):
    for cand in (512, 1024, 256, 128):
        if s % cand == 0:
            return cand
    return s  # TODO(synk): non-divisible very large Ho*Wo would need padded tiling.


def _bilinear_resize_matrix(out_size, in_size):
    """Row-stochastic (out_size, in_size) operator matching F.interpolate
    mode='bilinear', align_corners=False along one axis (2-tap, non-antialiased;
    valid for both up- and downsampling)."""
    A = np.zeros((out_size, in_size), dtype=np.float32)
    scale = in_size / out_size
    for i in range(out_size):
        src = max(scale * (i + 0.5) - 0.5, 0.0)
        i0 = int(np.floor(src))
        i1 = min(i0 + 1, in_size - 1)
        w1 = src - i0
        A[i, i0] += 1.0 - w1
        A[i, i1] += w1
    return A


# ---------------------------------------------------------------------------
# Kernel 1: conv3x3 / stride2 / pad1 + bias + ReLU + 1x1 classifier (channels-first)
#   x_col  : (N, 9*Cin, S) bf16   stride-2 im2col, S = Ho*Wo (spatial = lane dim)
#   w_conv : (Cmid, 9*Cin) bf16   rows of the contraction ordered (kh, kw, c)
#   returns logits (N, K, S) bf16
# ---------------------------------------------------------------------------
def fused_backbone_classifier(x_col, w_conv, b_conv, w_cls, b_cls):
    N, C9, S = x_col.shape
    Cmid = w_conv.shape[0]
    K = w_cls.shape[0]
    ts = _pick_spatial_tile(S)

    def kernel(x_ref, wc_ref, bc_ref, wk_ref, bk_ref, o_ref):
        xc = x_ref[0]                                                     # (9C, ts) bf16
        feat = jnp.dot(wc_ref[...], xc,
                       preferred_element_type=jnp.float32)                # (Cmid, ts) f32
        feat = jnp.maximum(feat + bc_ref[...], 0.0)
        logits = jnp.dot(wk_ref[...], feat.astype(jnp.bfloat16),
                         preferred_element_type=jnp.float32)              # (K, ts) f32
        o_ref[0] = (logits + bk_ref[...]).astype(jnp.bfloat16)

    block_bytes = (C9 * ts * 2 + Cmid * C9 * 2 + Cmid * 4
                   + K * Cmid * 2 + K * 4 + K * ts * 2)
    return pl.pallas_call(
        kernel,
        out_shape=jax.ShapeDtypeStruct((N, K, S), jnp.bfloat16),
        grid=(N, S // ts),
        in_specs=[
            pl.BlockSpec((1, C9, ts), lambda n, s: (n, 0, s)),
            pl.BlockSpec((Cmid, C9), lambda n, s: (0, 0)),
            pl.BlockSpec((Cmid, 1), lambda n, s: (0, 0)),
            pl.BlockSpec((K, Cmid), lambda n, s: (0, 0)),
            pl.BlockSpec((K, 1), lambda n, s: (0, 0)),
        ],
        out_specs=pl.BlockSpec((1, K, ts), lambda n, s: (n, 0, s)),
        compiler_params=pltpu.CompilerParams(
            dimension_semantics=("parallel", "parallel"),
            vmem_limit_bytes=_vmem_limit(block_bytes)),
    )(x_col, w_conv, b_conv, w_cls, b_cls)


# ---------------------------------------------------------------------------
# Kernel 2: separable F.interpolate(bilinear, align_corners=False), NCHW output.
#   out[n,k] = A_h @ logits[n,k] @ A_w^T     (grid over (N, K); f32 accumulation)
# ---------------------------------------------------------------------------
def bilinear_upsample_nchw(logits, A_h, A_wT):
    N, K, Ho, Wo = logits.shape
    H = A_h.shape[0]
    W = A_wT.shape[1]

    def kernel(x_ref, ah_ref, awt_ref, o_ref):
        x = x_ref[0, 0].astype(jnp.float32)                               # (Ho, Wo)
        t = jnp.dot(x, awt_ref[...], preferred_element_type=jnp.float32)  # (Ho, W)
        o_ref[0, 0] = jnp.dot(ah_ref[...], t,
                              preferred_element_type=jnp.float32)         # (H, W)

    block_bytes = Ho * Wo * 2 + H * Ho * 4 + Wo * W * 4 + H * W * 4
    return pl.pallas_call(
        kernel,
        out_shape=jax.ShapeDtypeStruct((N, K, H, W), jnp.float32),
        grid=(N, K),
        in_specs=[
            pl.BlockSpec((1, 1, Ho, Wo), lambda n, k: (n, k, 0, 0)),
            pl.BlockSpec((H, Ho), lambda n, k: (0, 0)),
            pl.BlockSpec((Wo, W), lambda n, k: (0, 0)),
        ],
        out_specs=pl.BlockSpec((1, 1, H, W), lambda n, k: (n, k, 0, 0)),
        compiler_params=pltpu.CompilerParams(
            dimension_semantics=("parallel", "parallel"),
            vmem_limit_bytes=_vmem_limit(block_bytes)),
    )(logits, A_h, A_wT)


# ---------------------------------------------------------------------------
# Model
# ---------------------------------------------------------------------------
class SimpleSegmentationModelPallas:
    def __init__(self, key, in_ch=4, mid_ch=16, num_classes=8):
        self.in_ch, self.mid_ch, self.num_classes = in_ch, mid_ch, num_classes
        k1, k2, k3, k4 = jax.random.split(key, 4)
        w_hwio = 0.1 * jax.random.normal(k1, (3, 3, in_ch, mid_ch), jnp.float32)
        self._w_conv_hwio = w_hwio                                         # f32 (reference)
        # (Cmid, 9*Cin) bf16, contraction rows ordered (kh, kw, c) to match the im2col.
        self.w_conv = w_hwio.reshape(9 * in_ch, mid_ch).T.astype(jnp.bfloat16)
        self.b_conv = 0.1 * jax.random.normal(k2, (mid_ch, 1), jnp.float32)
        w_cls = 0.1 * jax.random.normal(k3, (mid_ch, num_classes), jnp.float32)
        self._w_cls = w_cls                                                # f32 (reference)
        self.w_cls = w_cls.T.astype(jnp.bfloat16)                          # (K, Cmid)
        self.b_cls = 0.1 * jax.random.normal(k4, (num_classes, 1), jnp.float32)
        self.aux_classifier = None

    def _im2col_s2(self, x_nchw):
        """Stride-2 / pad-1 / 3x3 im2col built directly from NCHW in bf16:
        (N, 9*Cin, Ho*Wo); rows ordered tap-major (kh, kw) / channel-minor, spatial on lanes."""
        N, C, H, W = x_nchw.shape
        Ho, Wo = (H - 1) // 2 + 1, (W - 1) // 2 + 1
        xpad = jnp.pad(x_nchw.astype(jnp.bfloat16), ((0, 0), (0, 0), (1, 1), (1, 1)))
        wins = []
        for kh in range(3):
            for kw in range(3):
                wins.append(xpad[:, :, kh:kh + 2 * Ho - 1:2, kw:kw + 2 * Wo - 1:2])
        x_col = jnp.concatenate(wins, axis=1)                              # (N, 9C, Ho, Wo)
        return x_col.reshape(N, 9 * C, Ho * Wo), Ho, Wo

    def __call__(self, x_nchw):
        N, C, H, W = x_nchw.shape
        assert C == self.in_ch
        x_col, Ho, Wo = self._im2col_s2(x_nchw)

        # fused backbone conv + ReLU + 1x1 classifier (one kernel, channels-first)
        logits = fused_backbone_classifier(
            x_col, self.w_conv, self.b_conv, self.w_cls, self.b_cls)      # (N, K, Ho*Wo) bf16
        logits = logits.reshape(N, self.num_classes, Ho, Wo)               # metadata-only

        # separable F.interpolate(bilinear, align_corners=False) to the input size, NCHW out
        A_h = jnp.asarray(_bilinear_resize_matrix(H, Ho))                  # (H, Ho)
        A_wT = jnp.asarray(_bilinear_resize_matrix(W, Wo).T)               # (Wo, W)
        out = bilinear_upsample_nchw(logits, A_h, A_wT)                    # (N, K, H, W) f32
        return {"out": out}

    # Pure-JAX reference of the same math (for correctness checking).
    def reference(self, x_nchw):
        N, C, H, W = x_nchw.shape
        Ho, Wo = (H - 1) // 2 + 1, (W - 1) // 2 + 1
        x = jnp.transpose(x_nchw, (0, 2, 3, 1)).astype(jnp.float32)
        feat = lax.conv_general_dilated(
            x, self._w_conv_hwio, window_strides=(2, 2), padding=((1, 1), (1, 1)),
            dimension_numbers=("NHWC", "HWIO", "NHWC"))
        feat = jnp.maximum(feat + self.b_conv.reshape(1, 1, 1, -1), 0.0)
        logits = feat @ self._w_cls + self.b_cls.reshape(1, 1, 1, -1)      # (N, Ho, Wo, K)
        A_h = jnp.asarray(_bilinear_resize_matrix(H, Ho))
        A_w = jnp.asarray(_bilinear_resize_matrix(W, Wo))
        return jnp.einsum("Hh,nhwk,Ww->nkHW", A_h, logits, A_w)


# ---------------------------------------------------------------------------
if __name__ == "__main__":
    key = jax.random.PRNGKey(0)
    k_param, k_x = jax.random.split(key)

    model = SimpleSegmentationModelPallas(k_param, in_ch=4, mid_ch=16, num_classes=8)

    # input: NCHW like PyTorch
    x = jax.random.normal(k_x, (2, 4, 16, 16), jnp.float32)

    fwd = jax.jit(model.__call__)
    result = fwd(x)
    out = jax.block_until_ready(result["out"])
    assert out.shape == (2, 8, 16, 16) and out.dtype == jnp.float32

    # correctness vs pure-JAX f32 reference (bf16 kernel operands -> loose tolerance)
    ref = jax.block_until_ready(model.reference(x))
    np.testing.assert_allclose(np.asarray(out), np.asarray(ref), atol=3e-2, rtol=3e-2)

    print("KERNEL_OK")
</pallas_src>

<mosaic_0001>
module attributes {stable_mosaic.version = 11 : i64} {
  func.func @kernel(%arg0: i32, %arg1: i32, %arg2: memref<1x36x64xbf16, #tpu.memory_space<vmem>>, %arg3: memref<16x36xbf16, #tpu.memory_space<vmem>>, %arg4: memref<16x1xf32, #tpu.memory_space<vmem>>, %arg5: memref<8x16xbf16, #tpu.memory_space<vmem>>, %arg6: memref<8x1xf32, #tpu.memory_space<vmem>>, %arg7: memref<1x8x64xbf16, #tpu.memory_space<vmem>>) attributes {dimension_semantics = [#tpu.dimension_semantics<parallel>, #tpu.dimension_semantics<parallel>], iteration_bounds = array<i64: 2, 1>, scalar_prefetch = 0 : i64, scratch_operands = 0 : i64, tpu.core_type = #tpu.core_type<tc>, window_params = [{transform_indices = @transform_0, window_bounds = array<i64: 1, 36, 64>}, {pipeline_mode = #tpu.pipeline_mode<synchronous>, transform_indices = @transform_1, window_bounds = array<i64: 16, 36>}, {pipeline_mode = #tpu.pipeline_mode<synchronous>, transform_indices = @transform_2, window_bounds = array<i64: 16, 1>}, {pipeline_mode = #tpu.pipeline_mode<synchronous>, transform_indices = @transform_3, window_bounds = array<i64: 8, 16>}, {pipeline_mode = #tpu.pipeline_mode<synchronous>, transform_indices = @transform_4, window_bounds = array<i64: 8, 1>}, {transform_indices = @transform_5, window_bounds = array<i64: 1, 8, 64>}]} {
    %c0 = arith.constant 0 : index
    %c0_0 = arith.constant 0 : index
    %c0_1 = arith.constant 0 : index
    %0 = vector.load %arg2[%c0, %c0_0, %c0_1] : memref<1x36x64xbf16, #tpu.memory_space<vmem>>, vector<1x36x64xbf16>
    %1 = vector.shape_cast %0 : vector<1x36x64xbf16> to vector<36x64xbf16>
    %c0_2 = arith.constant 0 : index
    %c0_3 = arith.constant 0 : index
    %2 = vector.load %arg3[%c0_2, %c0_3] : memref<16x36xbf16, #tpu.memory_space<vmem>>, vector<16x36xbf16>
    %cst = arith.constant dense<0.000000e+00> : vector<16x64xf32>
    %3 = tpu.matmul %2, %1, %cst {dimension_numbers = #tpu.dot_dimension_numbers<[1], [0], [0], [1], [0, 0, 1, 1], [], []>} : vector<16x36xbf16>, vector<36x64xbf16>, vector<16x64xf32> -> vector<16x64xf32>
    %c0_4 = arith.constant 0 : index
    %c0_5 = arith.constant 0 : index
    %4 = vector.load %arg4[%c0_4, %c0_5] : memref<16x1xf32, #tpu.memory_space<vmem>>, vector<16x1xf32>
    %5 = vector.broadcast %4 : vector<16x1xf32> to vector<16x64xf32>
    %6 = arith.addf %3, %5 : vector<16x64xf32>
    %cst_6 = arith.constant 0.000000e+00 : f32
    %7 = vector.broadcast %cst_6 : f32 to vector<16x64xf32>
    %8 = arith.maximumf %6, %7 : vector<16x64xf32>
    %c0_7 = arith.constant 0 : index
    %c0_8 = arith.constant 0 : index
    %9 = vector.load %arg5[%c0_7, %c0_8] : memref<8x16xbf16, #tpu.memory_space<vmem>>, vector<8x16xbf16>
    %10 = arith.truncf %8 : vector<16x64xf32> to vector<16x64xbf16>
    %cst_9 = arith.constant dense<0.000000e+00> : vector<8x64xf32>
    %11 = tpu.matmul %9, %10, %cst_9 {dimension_numbers = #tpu.dot_dimension_numbers<[1], [0], [0], [1], [0, 0, 1, 1], [], []>} : vector<8x16xbf16>, vector<16x64xbf16>, vector<8x64xf32> -> vector<8x64xf32>
    %c0_10 = arith.constant 0 : index
    %c0_11 = arith.constant 0 : index
    %12 = vector.load %arg6[%c0_10, %c0_11] : memref<8x1xf32, #tpu.memory_space<vmem>>, vector<8x1xf32>
    %13 = vector.broadcast %12 : vector<8x1xf32> to vector<8x64xf32>
    %14 = arith.addf %11, %13 : vector<8x64xf32>
    %15 = arith.truncf %14 : vector<8x64xf32> to vector<8x64xbf16>
    %c0_12 = arith.constant 0 : index
    %c0_13 = arith.constant 0 : index
    %c0_14 = arith.constant 0 : index
    %16 = vector.load %arg7[%c0_12, %c0_13, %c0_14] : memref<1x8x64xbf16, #tpu.memory_space<vmem>>, vector<1x8x64xbf16>
    %17 = vector.shape_cast %16 : vector<1x8x64xbf16> to vector<8x64xbf16>
    %18 = vector.shape_cast %15 : vector<8x64xbf16> to vector<1x8x64xbf16>
    tpu.vector_store %arg7[%c0_12, %c0_13, %c0_14], %18 {strides = array<i32>} : memref<1x8x64xbf16, #tpu.memory_space<vmem>>, vector<1x8x64xbf16>,
    return
  }
  func.func @transform_0(%arg0: i32, %arg1: i32) -> (i32, i32, i32) {
    %c0_i32 = arith.constant 0 : i32
    %c0_i32_0 = arith.constant 0 : i32
    return %arg0, %c0_i32, %arg1 : i32, i32, i32
  }
  func.func @transform_1(%arg0: i32, %arg1: i32) -> (i32, i32) {
    %c0_i32 = arith.constant 0 : i32
    %c0_i32_0 = arith.constant 0 : i32
    %c0_i32_1 = arith.constant 0 : i32
    return %c0_i32, %c0_i32_0 : i32, i32
  }
  func.func @transform_2(%arg0: i32, %arg1: i32) -> (i32, i32) {
    %c0_i32 = arith.constant 0 : i32
    %c0_i32_0 = arith.constant 0 : i32
    %c0_i32_1 = arith.constant 0 : i32
    return %c0_i32, %c0_i32_0 : i32, i32
  }
  func.func @transform_3(%arg0: i32, %arg1: i32) -> (i32, i32) {
    %c0_i32 = arith.constant 0 : i32
    %c0_i32_0 = arith.constant 0 : i32
    %c0_i32_1 = arith.constant 0 : i32
    return %c0_i32, %c0_i32_0 : i32, i32
  }
  func.func @transform_4(%arg0: i32, %arg1: i32) -> (i32, i32) {
    %c0_i32 = arith.constant 0 : i32
    %c0_i32_0 = arith.constant 0 : i32
    %c0_i32_1 = arith.constant 0 : i32
    return %c0_i32, %c0_i32_0 : i32, i32
  }
  func.func @transform_5(%arg0: i32, %arg1: i32) -> (i32, i32, i32) {
    %c0_i32 = arith.constant 0 : i32
    %c0_i32_0 = arith.constant 0 : i32
    return %arg0, %c0_i32, %arg1 : i32, i32, i32
  }
}

module attributes {stable_mosaic.version = 11 : i64} {
  func.func @kernel(%arg0: i32, %arg1: i32, %arg2: memref<1x1x8x8xbf16, #tpu.memory_space<vmem>>, %arg3: memref<16x8xf32, #tpu.memory_space<vmem>>, %arg4: memref<8x16xf32, #tpu.memory_space<vmem>>, %arg5: memref<1x1x16x16xf32, #tpu.memory_space<vmem>>) attributes {dimension_semantics = [#tpu.dimension_semantics<parallel>, #tpu.dimension_semantics<parallel>], iteration_bounds = array<i64: 2, 8>, scalar_prefetch = 0 : i64, scratch_operands = 0 : i64, tpu.core_type = #tpu.core_type<tc>, window_params = [{transform_indices = @transform_0, window_bounds = array<i64: 1, 1, 8, 8>}, {pipeline_mode = #tpu.pipeline_mode<synchronous>, transform_indices = @transform_1, window_bounds = array<i64: 16, 8>}, {pipeline_mode = #tpu.pipeline_mode<synchronous>, transform_indices = @transform_2, window_bounds = array<i64: 8, 16>}, {transform_indices = @transform_3, window_bounds = array<i64: 1, 1, 16, 16>}]} {
    %c0 = arith.constant 0 : index
    %c0_0 = arith.constant 0 : index
    %c0_1 = arith.constant 0 : index
    %c0_2 = arith.constant 0 : index
    %0 = vector.load %arg2[%c0, %c0_0, %c0_1, %c0_2] : memref<1x1x8x8xbf16, #tpu.memory_space<vmem>>, vector<1x1x8x8xbf16>
    %1 = vector.shape_cast %0 : vector<1x1x8x8xbf16> to vector<8x8xbf16>
    %2 = arith.extf %1 : vector<8x8xbf16> to vector<8x8xf32>
    %c0_3 = arith.constant 0 : index
    %c0_4 = arith.constant 0 : index
    %3 = vector.load %arg4[%c0_3, %c0_4] : memref<8x16xf32, #tpu.memory_space<vmem>>, vector<8x16xf32>
    %cst = arith.constant dense<0.000000e+00> : vector<8x16xf32>
    %4 = tpu.matmul %2, %3, %cst {dimension_numbers = #tpu.dot_dimension_numbers<[1], [0], [0], [1], [0, 0, 1, 1], [], []>} : vector<8x8xf32>, vector<8x16xf32>, vector<8x16xf32> -> vector<8x16xf32>
    %c0_5 = arith.constant 0 : index
    %c0_6 = arith.constant 0 : index
    %5 = vector.load %arg3[%c0_5, %c0_6] : memref<16x8xf32, #tpu.memory_space<vmem>>, vector<16x8xf32>
    %cst_7 = arith.constant dense<0.000000e+00> : vector<16x16xf32>
    %6 = tpu.matmul %5, %4, %cst_7 {dimension_numbers = #tpu.dot_dimension_numbers<[1], [0], [0], [1], [0, 0, 1, 1], [], []>} : vector<16x8xf32>, vector<8x16xf32>, vector<16x16xf32> -> vector<16x16xf32>
    %c0_8 = arith.constant 0 : index
    %c0_9 = arith.constant 0 : index
    %c0_10 = arith.constant 0 : index
    %c0_11 = arith.constant 0 : index
    %7 = vector.load %arg5[%c0_8, %c0_9, %c0_10, %c0_11] : memref<1x1x16x16xf32, #tpu.memory_space<vmem>>, vector<1x1x16x16xf32>
    %8 = vector.shape_cast %7 : vector<1x1x16x16xf32> to vector<16x16xf32>
    %9 = vector.shape_cast %6 : vector<16x16xf32> to vector<1x1x16x16xf32>
    tpu.vector_store %arg5[%c0_8, %c0_9, %c0_10, %c0_11], %9 {strides = array<i32>} : memref<1x1x16x16xf32, #tpu.memory_space<vmem>>, vector<1x1x16x16xf32>,
    return
  }
  func.func @transform_0(%arg0: i32, %arg1: i32) -> (i32, i32, i32, i32) {
    %c0_i32 = arith.constant 0 : i32
    %c0_i32_0 = arith.constant 0 : i32
    %c0_i32_1 = arith.constant 0 : i32
    return %arg0, %arg1, %c0_i32, %c0_i32_0 : i32, i32, i32, i32
  }
  func.func @transform_1(%arg0: i32, %arg1: i32) -> (i32, i32) {
    %c0_i32 = arith.constant 0 : i32
    %c0_i32_0 = arith.constant 0 : i32
    %c0_i32_1 = arith.constant 0 : i32
    return %c0_i32, %c0_i32_0 : i32, i32
  }
  func.func @transform_2(%arg0: i32, %arg1: i32) -> (i32, i32) {
    %c0_i32 = arith.constant 0 : i32
    %c0_i32_0 = arith.constant 0 : i32
    %c0_i32_1 = arith.constant 0 : i32
    return %c0_i32, %c0_i32_0 : i32, i32
  }
  func.func @transform_3(%arg0: i32, %arg1: i32) -> (i32, i32, i32, i32) {
    %c0_i32 = arith.constant 0 : i32
    %c0_i32_0 = arith.constant 0 : i32
    %c0_i32_1 = arith.constant 0 : i32
    return %arg0, %arg1, %c0_i32, %c0_i32_0 : i32, i32, i32, i32
  }
}

</mosaic_0001>

<bundles_post_ra>
// kernel: a_call__.2
= control target key start
LH: loop header
LB: loop body
LE: loop exit
PB: predicated region body
PF: predicated region fallthrough
CT: control target
= control target key end

     0   :  { %s605_s18 = smov 0   ;;  %s607_s19 = smov 0   ;;  %s657_s0 = inlined_call_operand.vmem [shape: bf16[2,36,64], index: 0, kind: input, shape index: {}]   ;;  %s658_s1 = inlined_call_operand.vmem [shape: bf16[16,36], index: 1, kind: input, shape index: {}]   ;;  %s659_s2 = inlined_call_operand.vmem [shape: f32[16,1], index: 2, kind: input, shape index: {}]   ;;  %s660_s3 = inlined_call_operand.vmem [shape: bf16[8,16], index: 3, kind: input, shape index: {}]   ;;  %s661_s4 = inlined_call_operand.vmem [shape: f32[8,1], index: 4, kind: input, shape index: {}]   ;;  %s662_s5 = inlined_call_operand.vmem [shape: bf16[2,8,64], index: 5, kind: output, shape index: {}]  }
   0x1   :  { %s609_s20 = smov 0  }
   0x2 LB: > { %s27_s21 = sadd.s32 1, %s566_s19  ;;  %p481_p0 = scmp.ge.s32.totalorder %s570_s20, 1  ;;  %s570_s20 = sphi %s609_s20, %s15_s20   ;;  %s566_s19 = sphi %s607_s19, %s664_s19   ;;  %s562_s18 = sphi %s605_s18, %s663_s18  }
   0x3   : > { %p29_p1 = scmp.ge.s32.totalorder %s27_s21, 2  ;;  %p206_p2 = scmp.lt.s32.totalorder %s570_s20, 3 }
   0x5   : > { %s666_s21 = smov (%p29_p1, %s27_s21), 0  ;;  %p207_p3 = pnand %p481_p0, %p206_p2 }
   0x6   : > { %p239_p4 = scmp.lt.s32.totalorder (!%p207_p3), %s562_s18, 1  ;;  %v572_v0 = vmov (!%p207_p3), 0.0   ;;  %vm573_vm0 = vmmov (!%p207_p3), 0   ;;  %v262_v1 = vld [vmem:[%s659_s2] sm:$0xff] (!%p207_p3)  ;;  %v574_v2 = vmov (!%p207_p3), 0   ;;  %v263_v3 = vld [vmem:[%s659_s2 + $0x8] sm:$0xff] (!%p207_p3) }
   0x7   : > { %210 = sbr.rel (%p207_p3) target bundleno = 470 (0x1d6), region = 40  ;;  %498 = vmatprep.subr.bf16.mxu0 (!%p207_p3), %v572_v0  ;;  %504 = vmatprep.mubr.msk.bf16.mxu0 (!%p207_p3), %vm573_vm0, %v572_v0  ;;  %vm298_vm1 = vcmask (!%p207_p3), 1041408   ;;  %v547_v8 = vld [vmem:[%s658_s1] sm:$0xff] (!%p207_p3)   ;;  %vm294_vm2 = vcmask (!%p207_p3), 293888   ;;  %vm353_vm3 = vcmask (!%p207_p3), 130048   ;;  %vm398_vm4 = vcmask (!%p207_p3), 519168  }
   0x8   : > { %542 = vset.pattern.permute.xlu0 (!%p207_p3), %v574_v2  ;;  %508 = vmatprep.subr.bf16.mxu1 (!%p207_p3), %v572_v0  ;;  %v347_v9 = vld [vmem:[%s661_s4] sm:$0xff] (!%p207_p3) }
   0x9   : > { %266 = vperm.xlu0 (!%p207_p3), %542, %v262_v1   ;;  %510 = vmatprep.mubr.msk.bf16.mxu1 (!%p207_p3), %vm573_vm0, %v572_v0  ;;  %v345_v21 = vld [vmem:[%s660_s3] sm:$0xf] (!%p207_p3) }
   0xa   : > { %543 = vset.pattern.permute.xlu1 (!%p207_p3), %v574_v2 }
   0xb   : > { %350 = vperm.xlu1 (!%p207_p3), %543, %v347_v9  }
   0xd   : > { %271 = vperm.xlu0 (!%p207_p3), %542, %v263_v3  }
   0xe   : > { %s668_s18 = smov (!%p239_p4, %s562_s18), 1 }
   0xf   : > { %s514_s24 = smul.u32 20, %s668_s18  ;;  %s483_s11 = sshll.u32 %s668_s18, 2 }
  0x10   : > { %s253_s14 = scalar_lea.vmem %s662_s5, %s483_s11 }
  0x11   : > { %s246_s29 = scalar_lea.vmem %s657_s0, %s514_s24 }
  0x12   : > { %v544_v4 = vld [vmem:[%s246_s29] sm:$0xff]   ;;  %v545_v5 = vld [vmem:[%s246_s29 + $0x8] sm:$0xff]   ;;  %v546_v6 = vld [vmem:[%s246_s29 + $0x10] ss:$0 sps:$4 sm:$0x33]  }
  0x13   : > { %499 = vmatpush3.bf16.msra.mxu0 %v544_v4  ;;  %v300_v7 = vsel %vm298_vm1, %v546_v6, 0 }
  0x14   : > { %500 = vmatprep.subr.bf16.mxu0 %v572_v0 }
  0x17   : > { %501 = vmatpush3.bf16.msra.mxu0 %v545_v5 }
  0x18   : > { %502 = vmatprep.subr.bf16.mxu0 %v572_v0 }
  0x1b   : > { %503 = vmatpush3.bf16.msra.mxu0 %v300_v7 }
  0x1e   : > { %505 = vmatmul.mubr.msk.bf16.vlgmr.msra.gmra.mrb[0].mxu0 %vm294_vm2, %v547_v8 }
  0x88   : > { %v267_v10 = vpop.permute.xlu0 %266 }
  0x8a   : > { %v351_v22 = vpop.permute.xlu1 %350 }
  0x8c   : > { %v272_v14 = vpop.permute.xlu0 %271 }
  0xf1   : > { %v336_v11 = vpop.f32.mrb[0].mxu0 }
  0xf2   : > { %v337_v12 = vadd.f32 %v336_v11, %v267_v10  ;;  %v506_v13 = vpop.f32.mrb[1].mxu0 }
  0xf3   : > { %v339_v15 = vpop.f32.mrb[2].mxu0 }
  0xf4   : > { %v340_v16 = vadd.f32 %v339_v15, %v272_v14  ;;  %v507_v17 = vpop.f32.mrb[3].mxu0  ;;  %v343_v18 = vmax.f32 %v337_v12, 0.0 }
  0xf6   : > { %v344_v19 = vmax.f32 %v340_v16, 0.0 }
  0xf8   : > { %v346_v20 = vpack.c.bf16 %v344_v19, %v343_v18 }
  0xfa   : > { %509 = vmatpush3.bf16.msra.mxu1 %v346_v20 }
  0xfd   : > { %511 = vmatmul.mubr.msk.bf16.vlgmr.msra.gmra.mrb[0].mxu1 %vm353_vm3, %v345_v21 }
 0x1d0   : > { %v391_v23 = vpop.f32.mrb[0].mxu1 }
 0x1d1   : > { %v392_v24 = vadd.f32 %v391_v23, %v351_v22  ;;  %v512_v25 = vpop.f32.mrb[1].mxu1 }
 0x1d2   : > { %v394_v26 = vpop.f32.mrb[2].mxu1 }
 0x1d3   : > { %v397_v27 = vpack.c.bf16 %v392_v24, %v392_v24  ;;  %v513_v28 = vpop.f32.mrb[3].mxu1 }
 0x1d5   : > { %399 = vst.msk [vmem:[%s253_s14] sm:$0xf] %vm398_vm4, %v397_v27 }
 0x1d6 PF: > { %s15_s20 = sadd.s32 1, %s570_s20   ;;  %s663_s18 = smov %s566_s19 }
 0x1d7   : > { %p12_p5 = scmp.ge.s32.totalorder %s15_s20, 4   ;;  %s664_s19 = smov %s666_s21 }
 0x1d9   :  { %14 = sbr.rel (!%p12_p5) target bundleno = 2 (0x2), region = 70 }

// kernel: a_call__.3
= control target key start
LH: loop header
LB: loop body
LE: loop exit
PB: predicated region body
PF: predicated region fallthrough
CT: control target
= control target key end

     0   :  { %8 = vsyncpa [#allocation3], 0  ;;  %s832_s0 = inlined_call_operand.vmem [shape: bf16[2,8,8,8], index: 0, kind: input, shape index: {}]   ;;  %s833_s1 = inlined_call_operand.vmem [shape: f32[16,8], index: 1, kind: input, shape index: {}]   ;;  %s834_s2 = inlined_call_operand.vmem [shape: f32[8,16], index: 2, kind: input, shape index: {}]   ;;  %s835_s3 = inlined_call_operand.hbm [shape: f32[2,8,16,16], index: 3, kind: output, shape index: {}]  }
   0x1   :  { %10 = vsyncpa [#allocation3 + $0x1], 0  ;;  %s683_s12 = smov 0   ;;  %s685_s13 = smov 0  }
   0x2   :  { %s687_s14 = smov 0   ;;  %s689_s15 = smov 0  }
   0x3   :  { %s691_s16 = smov 0   ;;  %s693_s17 = smov 0  }
   0x4   :  { %s695_s18 = smov 0   ;;  %s697_s19 = smov 0  }
   0x5 LB: > { %s455_s20 = sadd.s32 4294967295, %s656_s19   ;;  %s456_s21 = sadd.s32 4294967294, %s656_s19   ;;  %s656_s19 = sphi %s697_s19, %s16_s19   ;;  %s652_s18 = sphi %s695_s18, %s844_s18   ;;  %s648_s17 = sphi %s693_s17, %s843_s17   ;;  %s644_s16 = sphi %s691_s16, %s842_s16   ;;  %s640_s15 = sphi %s689_s15, %s841_s15   ;;  %s636_s14 = sphi %s687_s14, %s840_s14   ;;  %s632_s13 = sphi %s685_s13, %s839_s13   ;;  %s628_s12 = sphi %s683_s12, %s838_s12  }
   0x6   : > { %s25_s22 = sadd.s32 1, %s648_s17  ;;  %s28_s23 = sadd.s32 1, %s652_s18 }
   0x7   : > { %p26_p0 = scmp.ge.s32.totalorder %s25_s22, 8  ;;  %p117_p1 = scmp.ne.s32.totalorder %s636_s14, %s632_s13 }
   0x8   : > { %p118_p2 = scmp.eq.s32.totalorder %s455_s20, 15  ;;  %p123_p5 = scmp.ne.s32.totalorder %s632_s13, %s628_s12 }
   0x9   : > { %s846_s22 = smov (%p26_p0, %s25_s22), 0  ;;  %s848_s23 = smov (!%p26_p0, %s28_s23), %s652_s18 }
   0xa   : > { %s103_s24 = ssub.s32 %s648_s17, %s846_s22  ;;  %p734_p3 = por %p118_p2, %p117_p1 }
   0xb   : > { %p30_p4 = scmp.ge.s32.totalorder %s848_s23, 2  ;;  %p124_p6 = scmp.eq.s32.totalorder %s456_s21, 15 }
   0xc   : > { %p459_p7 = scmp.ge.s32.totalorder %s656_s19, 1  ;;  %p159_p9 = scmp.lt.s32.totalorder %s656_s19, 17 }
   0xd   : > { %s850_s23 = smov (%p30_p4, %s848_s23), 0  ;;  %p743_p8 = por %p124_p6, %p123_p5 }
   0xe   : > { %s102_s27 = ssub.s32 %s652_s18, %s850_s23  ;;  %s107_s28 = sadd.s32 1, %s636_s14 }
   0xf   : > { %s104_s29 = sor.u32 %s103_s24, %s102_s27  ;;  %p160_p10 = pnand %p459_p7, %p159_p9 }
  0x10   : > { %p105_p11 = scmp.eq.s32.totalorder %s104_s29, 0  ;;  %v196_v0 = vld [vmem:[%s834_s2] sm:$0xff] (!%p160_p10)  ;;  %p186_p12 = scmp.lt.s32.totalorder (!%p160_p10), %s644_s16, 1  ;;  %v658_v1 = vmov (!%p160_p10), 0.0   ;;  %vm659_vm0 = vmmov (!%p160_p10), 0   ;;  %vm197_vm1 = vcmask (!%p160_p10), 64512  }
  0x11   : > { %163 = sbr.rel (%p160_p10) target bundleno = 475 (0x1db), region = 32  ;;  %p188_p13 = scmp.lt.s32.totalorder (!%p160_p10), %s640_s15, 7  ;;  %477 = vmatprep.subr.mxu0 (!%p160_p10), %v658_v1  ;;  %479 = vmatprep.mubr.msk.f32.mxu0 (!%p160_p10), %vm659_vm0, %v658_v1  ;;  %v271_v4 = vld [vmem:[%s833_s1] sm:$0xff] (!%p160_p10)  ;;  %v272_v6 = vld [vmem:[%s833_s1 + $0x8] sm:$0xff] (!%p160_p10)  ;;  %vm354_vm2 = vcmask (!%p160_p10), 130048  }
  0x12   : > { %s752_s30 = scalar_select %p105_p11, %s636_s14, %s107_s28  }
  0x13   : > { %478 = vmatpush3.msra.mxu0 (!%p160_p10), %v196_v0  ;;  %484 = vmatprep.mubr.msk.f32.mxu1 (!%p160_p10), %vm197_vm1, %v271_v4  ;;  %s183_s4 = sand.u32 (!%p160_p10), 1, %s632_s13   ;;  %s660_s27 = smov (!%p160_p10), [#allocation2]  }
  0x14   : > { %s460_s5 = sshll.u32 (!%p160_p10), %s183_s4, 4  ;;  %s566_s28 = sshll.u32 (!%p160_p10), %s660_s27, 4  ;;  %s567_s28 = int_to_ptr.vmem [resolvable:$false] %s566_s28 }
  0x15   : > { %s568_s29 = scalar_lea.vmem (!%p160_p10), %s567_s28, 512 }
  0x18   : > { %s187_s6 = scalar_select %p186_p12, %s644_s16, 1 }
  0x19   : > { %s189_s7 = scalar_select %p188_p13, %s640_s15, 7 }
  0x1a   : > { %s461_s8 = sshll.u32 %s187_s6, 3  ;;  %s467_s6 = sshll.u32 %s640_s15, 1 }
  0x1b   : > { %s191_s9 = sadd.s32 %s461_s8, %s189_s7  ;;  %s468_s7 = sshll.u32 %s644_s16, 4 }
  0x1c   : > { %s462_s10 = sshll.u32 %s191_s9, 2  ;;  %s370_s8 = sadd.s32 %s468_s7, %s467_s6 }
  0x1d   : > { %s193_s21 = scalar_lea.vmem %s832_s0, %s462_s10  ;;  %s185_s9 = scalar_lea.vmem [#allocation2], %s460_s5 }
  0x1e   : > { %v194_v2 = vld [vmem:[%s193_s21] sm:$0xf]  ;;  %s373_s10 = sshll.u32 %s185_s9, 4  ;;  %s469_s11 = sshll.u32 %s370_s8, 7  ;;  %s773_s10 = int_to_ptr.vmem [resolvable:$true] %s373_s10 }
  0x1f   : > { %v195_v3 = vunpack.c.l.bf16 %v194_v2  ;;  %s778_s24 = scalar_lea.hbm %s835_s3, %s469_s11  ;;  %s780_s15 = scalar_lea.sflag [#allocation3], %s183_s4 }
  0x20   : > { %s562_s16 = scalar_lea.vmem %s773_s10, 256  ;;  %p569_p4 = scmp.lt.s32.totalorder %s773_s10, %s567_s28 }
  0x21   : > { %480 = vmatmul.mubr.msk.f32.vlgmr.msra.gmra.mrb[0].mxu0 %vm197_vm1, %v195_v3  ;;  %p563_p0 = scmp.ne.s32.totalorder %s773_s10, %s562_s16  ;;  %p570_p5 = scmp.lt.s32.totalorder %s568_s29, %s562_s16 }
  0x23   : > { %p564_p1 = pnand %p563_p0, %p734_p3  ;;  %p571_p6 = por %p570_p5, %p569_p4 }
  0x25   : > { %p565_p2 = pneg %p564_p1 }
  0x27   : > { %p572_p7 = pnand %p571_p6, %p565_p2 }
  0xf4   : > { %v267_v5 = vpop.f32.mrb[0].mxu0 }
  0xf5   : > { %v481_v7 = vpop.f32.mrb[1].mxu0  ;;  %482 = vmatprep.subr.mxu1 %v267_v5 }
  0xf6   : > { %483 = vmatpush3.msra.mxu1 %v267_v5 }
  0xf7   : > { %485 = vmatmul.mubr.msk.f32.vlgmr.msra.gmra.mrb[0].mxu1 %vm197_vm1, %v272_v6 }
 0x1ca   : > { %v486_v8 = vpop.f32.mrb[0].mxu1 }
 0x1cb   : > { %356 = vst.msk [vmem:[%s185_s9 + $0x8] sm:$0xff] %vm354_vm2, %v486_v8  ;;  %v345_v9 = vpop.f32.mrb[1].mxu1 }
 0x1cc   : > { %355 = vst.msk [vmem:[%s185_s9] sm:$0xff] %vm354_vm2, %v345_v9 }
 0x1cd   : > { %575 = shalt.err (!%p572_p7)
}
 0x1ce   : > { %s576_s4 = scalar_lea.hbm %s778_s24, 256  ;;  %s580_s7 = scalar_lea.hbm %s835_s3, 4096 }
 0x1cf   : > { %p577_p9 = scmp.ne.s32.totalorder %s778_s24, %s576_s4  ;;  %p581_p12 = scmp.lt.u32.totalorder %s778_s24, %s835_s3 }
 0x1d0   : > { %p582_p13 = scmp.lt.u32.totalorder %s580_s7, %s576_s4  ;;  %p584_p1 = scmp.lt.u32.totalorder %s576_s4, %s778_s24 }
 0x1d1   : > { %p578_p10 = pnand %p577_p9, %p734_p3 }
 0x1d2   : > { %p583_p0 = por %p582_p13, %p581_p12 }
 0x1d3   : > { %p579_p11 = pneg %p578_p10 }
 0x1d4   : > { %p585_p2 = por %p584_p1, %p583_p0 }
 0x1d6   : > { %p586_p4 = pnand %p585_p2, %p579_p11 }
 0x1d8   : > { %589 = shalt.err (!%p586_p4)
}
 0x1d9   : > { %s661_s11 = smov 128   ;;  %s662_s20 = smov 8  }
 0x1da   : > { %487 = dma.vmem_to_hbm [thread:$0]  (%p734_p3), %s773_s10, 256, %s778_s24, %s780_s15, %s661_s11, %s661_s11, %s662_s20  }
 0x1db PF: > { %p493_p5 = scmp.ge.s32.totalorder %s656_s19, 2  ;;  %s388_s21 = sand.u32 1, %s628_s12  }
 0x1dc   : > { %s389_s16 = scalar_lea.sflag [#allocation3], %s388_s21 }
 0x1dd   : > { %p490_p6 = pnand %p493_p5, %p743_p8 }
 0x1df   : > { %623 = dma.done.wait (!%p490_p6), %s389_s16, 256  }
 0x1e0   : > { %625 = vsyncadd (!%p490_p6), %s389_s16, 4294967040  ;;  %s16_s19 = sadd.s32 1, %s656_s19   ;;  %s838_s12 = smov %s632_s13 }
 0x1e1   : > { %p13_p7 = scmp.ge.s32.totalorder %s16_s19, 18   ;;  %s839_s13 = smov %s636_s14 }
 0x1e2   : > { %s840_s14 = smov %s752_s30  ;;  %s841_s15 = smov %s648_s17 }
 0x1e3   : > { %s842_s16 = smov %s652_s18  ;;  %s843_s17 = smov %s846_s22 }
 0x1e4   : > { %s844_s18 = smov %s850_s23  ;;  %15 = sbr.rel (!%p13_p7) target bundleno = 5 (0x5), region = 67 }
 0x1eb   :  { %394 = vsyncpa [#allocation3], 1 }
 0x1ec   :  { %396 = vsyncpa [#allocation3 + $0x1], 1 }

</bundles_post_ra>
